<compile_context>
chip_gen: v7x
topology: tpu7x:2x2x1
jax: 0.10.0
libtpu: 0.0.40
codegen_flags: <defaults>
</compile_context>

<pallas_src>
import functools

import jax
import jax.numpy as jnp
from jax import lax
from jax.experimental import pallas as pl
from jax.experimental.pallas import tpu as pltpu

BN_EPS = 1e-5          # nn.BatchNorm1d default eps
LEAKY_SLOPE = 0.01     # F.leaky_relu default negative_slope


def _leaky_relu(x):
    return jnp.where(x > 0, x, LEAKY_SLOPE * x)


# ---------------------------------------------------------------------------
# Host-side parameter preprocessing (exact re-parameterisations, run once)
# ---------------------------------------------------------------------------
def default_bn(d):
    """(running_mean, running_var, gamma, beta) of a fresh BatchNorm1d(d)."""
    return (jnp.zeros((d,), jnp.float32), jnp.ones((d,), jnp.float32),
            jnp.ones((d,), jnp.float32), jnp.zeros((d,), jnp.float32))


def fold_bn_into_first(w0, b0, bn):
    """BN(x) @ W0 + b0  ==  x @ W0' + b0'   (inference-mode BN)."""
    mean, var, gamma, beta = bn
    g = gamma / jnp.sqrt(var + BN_EPS)                 # (din,)
    w = w0 * g[:, None]
    shift = (beta - mean * g) @ w0                     # (dout,)
    b = shift[None, :] + (b0 if b0 is not None else 0.0)
    return w, b


def fold_encoder_params(layers, scale, bn):
    """Fold BN into layer 0 and output_scale into the last layer weight."""
    ws = [w for w, _ in layers]
    bs = [b for _, b in layers]
    w0, b0 = fold_bn_into_first(ws[0], bs[0], bn)
    ws = [w0] + ws[1:]
    bs = [b0] + bs[1:]
    ws[-1] = ws[-1] * scale                            # (1, dout) broadcast, exact
    return list(zip(ws, bs))


def build_fused_aux_params(aux_raw, aux_bns, ldim):
    """Fuse the n_aux identical-architecture aux nets into one MLP.

    Layer 0: weights concatenated along the output dim (shared input x0).
    Middle layers: block-diagonal (nets stay independent).
    Last layer: block-diagonal, then columns expanded/regrouped so the output is
      [ mu repeated per 2x2 block (ldim) | omega repeated per 2x2 block (ldim) ].
    """
    from jax.scipy.linalg import block_diag
    n_aux = len(aux_raw)
    folded = [fold_encoder_params(l, s, bn) for (l, s), bn in zip(aux_raw, aux_bns)]
    n_layers = len(folded[0])
    fused = []
    for j in range(n_layers):
        ws = [folded[k][j][0] for k in range(n_aux)]
        bs = [folded[k][j][1] for k in range(n_aux)]
        wcat = jnp.concatenate(ws, axis=1) if j == 0 else block_diag(*ws)
        bcat = jnp.concatenate(bs, axis=1) if bs[0] is not None else None
        if j == n_layers - 1:
            # net k's (mu, omega) columns sit at (2k, 2k+1); duplicate + regroup.
            idx = jnp.arange(ldim)
            col_src = jnp.concatenate([2 * (idx // 2), 2 * (idx // 2) + 1])
            wcat = wcat[:, col_src]
            if bcat is not None:
                bcat = bcat[:, col_src]
        fused.append((wcat, bcat))
    return fused


def make_pair_swap_matrix(ldim):
    """Ps with Ps[2k,2k+1]=+1, Ps[2k+1,2k]=-1 : (y @ Ps)[2k]=-y[2k+1], [2k+1]=+y[2k]."""
    r = jnp.arange(ldim)[:, None]
    c = jnp.arange(ldim)[None, :]
    return jnp.where((r % 2 == 0) & (c == r + 1), 1.0,
                     jnp.where((r % 2 == 1) & (c == r - 1), -1.0, 0.0)
                     ).astype(jnp.float32)


# ---------------------------------------------------------------------------
# The fused kernel: encoder + aux MLP + closed-form Koopman rollout, per batch
# element (grid=(B,)).
# ---------------------------------------------------------------------------
def make_fused_kernel(enc_has_bias, aux_has_bias, dt, n_shifts, dim, ldim):
    n_enc = len(enc_has_bias)
    n_auxl = len(aux_has_bias)

    def kernel(*refs):
        idx = 0
        x_ref = refs[idx]; idx += 1                       # (1, n_shifts, dim)
        enc_params = []
        for hb in enc_has_bias:
            w = refs[idx]; idx += 1
            b = refs[idx] if hb else None
            idx += 1 if hb else 0
            enc_params.append((w, b))
        aux_params = []
        for hb in aux_has_bias:
            w = refs[idx]; idx += 1
            b = refs[idx] if hb else None
            idx += 1 if hb else 0
            aux_params.append((w, b))
        ps_ref = refs[idx]; idx += 1                      # (ldim, ldim)
        cwt_ref = refs[idx]; idx += 1                     # (ldim, dim) == C.weight.T
        y_ref = refs[idx]; idx += 1                       # (1, n_shifts, dim+ldim)
        yp_ref = refs[idx]; idx += 1                      # (1, n_shifts, dim+ldim)

        x_b = x_ref[0]                                    # (n_shifts, dim), raw frames

        # ---- encoder MLP (BN and output_scale pre-folded into the weights) ----
        h = x_b
        for li, (w_ref, b_ref) in enumerate(enc_params):
            h = jnp.dot(h, w_ref[...], preferred_element_type=jnp.float32)
            if b_ref is not None:
                h = h + b_ref[...]
            if li < n_enc - 1:
                h = _leaky_relu(h)                        # Dropout(p=0) == identity
        # fused output:  y = cat(xs, enc(xs))
        y_ref[0, :, :dim] = x_b.astype(y_ref.dtype)
        y_ref[0, :, dim:] = h.astype(y_ref.dtype)

        # ---- fused aux nets: one MLP producing mu/omega repeated per block ----
        x0 = x_b[0:1, :]                                  # (1, dim)
        y0 = h[0:1, :]                                    # (1, ldim)
        a = x0
        for li, (w_ref, b_ref) in enumerate(aux_params):
            a = jnp.dot(a, w_ref[...], preferred_element_type=jnp.float32)
            if b_ref is not None:
                a = a + b_ref[...]
            if li < n_auxl - 1:
                a = _leaky_relu(a)
        mu_row = a[:, :ldim]                              # (1, ldim)
        om_row = a[:, ldim:]                              # (1, ldim)

        # ---- closed-form Koopman rollout:  y_t = y0 @ K^t  (elementwise) ----
        t_idx = lax.broadcasted_iota(jnp.int32, (n_shifts, 1), 0)
        t_col = t_idx.astype(jnp.float32)
        grow = jnp.exp(t_col * (mu_row * dt))             # (n_shifts, ldim)
        ang = t_col * (om_row * dt)
        c_row = jnp.cos(ang) * grow
        s_row = jnp.sin(ang) * grow
        y0_swap = jnp.dot(y0, ps_ref[...], preferred_element_type=jnp.float32)
        y_all = y0 * c_row + y0_swap * s_row              # (n_shifts, ldim)

        # C projection hoisted out of the recurrence: one matmul for all steps.
        xp = jnp.dot(y_all, cwt_ref[...], preferred_element_type=jnp.float32)
        xp = jnp.where(t_idx == 0, x0, xp)                # t=0 prediction is raw x0

        yp_ref[0, :, :dim] = xp.astype(yp_ref.dtype)
        yp_ref[0, :, dim:] = y_all.astype(yp_ref.dtype)

    return kernel


# ---------------------------------------------------------------------------
# Wrapper: one pallas_call, grid over the batch dimension.
# ---------------------------------------------------------------------------
def denis_jbf_forward(xs, params, dt, n_shifts):
    B, T, dim = xs.shape
    cwt = params["cwt"]
    ldim = cwt.shape[0]
    enc_layers = params["enc_folded"]
    aux_layers = params["aux_fused"]
    ps = params["ps"]

    xs_t = xs[:, :n_shifts, :]                            # (B, n_shifts, dim)

    enc_has_bias = tuple(b is not None for _, b in enc_layers)
    aux_has_bias = tuple(b is not None for _, b in aux_layers)

    flat = [xs_t]
    for w, b in enc_layers:
        flat.append(w)
        if b is not None:
            flat.append(b)
    for w, b in aux_layers:
        flat.append(w)
        if b is not None:
            flat.append(b)
    flat.append(ps)
    flat.append(cwt)

    def full_spec(a):
        nd = a.ndim
        return pl.BlockSpec(a.shape, lambda *_, nd=nd: (0,) * nd)

    in_specs = [pl.BlockSpec((1, n_shifts, dim), lambda b: (b, 0, 0))]
    in_specs += [full_spec(a) for a in flat[1:]]

    out_block = pl.BlockSpec((1, n_shifts, dim + ldim), lambda b: (b, 0, 0))
    out_shape = (jax.ShapeDtypeStruct((B, n_shifts, dim + ldim), jnp.float32),
                 jax.ShapeDtypeStruct((B, n_shifts, dim + ldim), jnp.float32))

    kernel = make_fused_kernel(enc_has_bias, aux_has_bias, dt, n_shifts, dim, ldim)
    y, y_pred = pl.pallas_call(
        kernel,
        grid=(B,),
        in_specs=in_specs,
        out_specs=(out_block, out_block),
        out_shape=out_shape,
        compiler_params=pltpu.CompilerParams(dimension_semantics=("parallel",)),
    )(*flat)
    return y, y_pred


# ---------------------------------------------------------------------------
# Deterministic parameter construction (mirrors module __init__ shapes)
# ---------------------------------------------------------------------------
def init_encoder_params(key, shape):
    layers = []
    for j in range(len(shape) - 1):
        kw = jax.random.fold_in(key, 2 * j)
        kb = jax.random.fold_in(key, 2 * j + 1)
        w = jax.random.normal(kw, (shape[j], shape[j + 1]), jnp.float32) * 0.1
        has_bias = (j + 2 != len(shape))       # last affine layer has no bias
        b = (jax.random.normal(kb, (1, shape[j + 1]), jnp.float32) * 0.05
             if has_bias else None)
        layers.append((w, b))
    scale = jnp.ones((1, shape[-1]), jnp.float32)          # output_scale init
    return layers, scale


# ---------------------------------------------------------------------------
# Pure-JAX reference of the PyTorch forward (for a numerical self-check)
# ---------------------------------------------------------------------------
def encoder_ref(x2d, layers, scale, bn):
    mean, var, gamma, beta = bn
    h = (x2d - mean) / jnp.sqrt(var + BN_EPS) * gamma + beta
    n = len(layers)
    for j, (w, b) in enumerate(layers):
        h = h @ w
        if b is not None:
            h = h + b
        if j < n - 1:
            h = jnp.where(h > 0, h, LEAKY_SLOPE * h)
    return h * scale


def denis_ref(xs, raw, dt, n_shifts):
    B, T, dim = xs.shape
    enc_layers, enc_scale = raw["encoder"]
    cwt = raw["cwt"]
    ldim = cwt.shape[0]
    x0 = xs[:, 0, :]
    aux_outs = [encoder_ref(x0, l, s, bn) for (l, s), bn in zip(raw["aux"], raw["aux_bn"])]
    aux_out = jnp.stack(aux_outs, axis=1)                  # (B, n_aux, 2)
    mu, om = aux_out[..., 0], aux_out[..., 1]
    scale = jnp.exp(mu * dt)
    cost, sint = jnp.cos(om * dt) * scale, jnp.sin(om * dt) * scale
    n_aux = mu.shape[1]
    K = jnp.zeros((B, ldim, ldim), jnp.float32)
    for k in range(n_aux):
        K = K.at[:, 2 * k, 2 * k].set(cost[:, k])
        K = K.at[:, 2 * k, 2 * k + 1].set(sint[:, k])
        K = K.at[:, 2 * k + 1, 2 * k].set(-sint[:, k])
        K = K.at[:, 2 * k + 1, 2 * k + 1].set(cost[:, k])
    xs_t = xs[:, :n_shifts, :]
    enc = encoder_ref(xs_t.reshape(-1, dim), enc_layers, enc_scale,
                      raw["encoder_bn"]).reshape(B, n_shifts, ldim)
    y = jnp.concatenate([xs_t, enc], axis=-1)
    yp, xp = [enc[:, 0, :]], [xs_t[:, 0, :]]
    for _ in range(n_shifts - 1):
        y_next = jnp.einsum("bi,bij->bj", yp[-1], K)
        yp.append(y_next)
        xp.append(y_next @ cwt)
    y_pred = jnp.concatenate([jnp.stack(xp, 1), jnp.stack(yp, 1)], axis=2)
    return y, y_pred


if __name__ == "__main__":
    # config (small, consistent with the module's asserts)
    enc_x_shape = [4, 32, 32, 8]       # dim=4, ldim=8 (even)
    aux_shape = [4, 16, 2]             # aux_shape[0]==dim, aux_shape[-1]==2
    dim, ldim = enc_x_shape[0], enc_x_shape[-1]
    n_aux = ldim // 2
    n_shifts = 6
    dt = 0.1
    B, T = 2, 8

    key = jax.random.PRNGKey(0)
    kx, ke, kc, kaux = jax.random.split(key, 4)

    xs = jax.random.normal(kx, (B, T, dim), jnp.float32)

    enc_layers, enc_scale = init_encoder_params(ke, enc_x_shape)
    aux_raw = [init_encoder_params(jax.random.fold_in(kaux, k), aux_shape)
               for k in range(n_aux)]
    C_w = jax.random.normal(kc, (dim, ldim), jnp.float32) * 0.1   # torch Linear (out,in)
    cwt = C_w.T                                                   # (ldim, dim)

    enc_bn = default_bn(dim)
    aux_bns = [default_bn(dim) for _ in range(n_aux)]

    params = {
        "enc_folded": fold_encoder_params(enc_layers, enc_scale, enc_bn),
        "aux_fused": build_fused_aux_params(aux_raw, aux_bns, ldim),
        "ps": make_pair_swap_matrix(ldim),
        "cwt": cwt,
    }

    fwd = jax.jit(functools.partial(denis_jbf_forward, dt=dt, n_shifts=n_shifts))
    y, y_pred = fwd(xs, params)
    jax.block_until_ready((y, y_pred))
    assert y.shape == (B, n_shifts, dim + ldim)
    assert y_pred.shape == (B, n_shifts, dim + ldim)

    # numerical self-check against a pure-JAX mirror of the PyTorch math
    raw = {"encoder": (enc_layers, enc_scale), "encoder_bn": enc_bn,
           "aux": aux_raw, "aux_bn": aux_bns, "cwt": cwt}
    y_exp, yp_exp = denis_ref(xs, raw, dt, n_shifts)
    assert bool(jnp.allclose(y, y_exp, atol=1e-4, rtol=1e-4))
    assert bool(jnp.allclose(y_pred, yp_exp, atol=1e-4, rtol=1e-4))

    print("KERNEL_OK")
</pallas_src>

<mosaic_0001>
module attributes {stable_mosaic.version = 11 : i64} {
  func.func @kernel(%arg0: i32, %arg1: memref<1x6x4xf32, #tpu.memory_space<vmem>>, %arg2: memref<4x32xf32, #tpu.memory_space<vmem>>, %arg3: memref<1x32xf32, #tpu.memory_space<vmem>>, %arg4: memref<32x32xf32, #tpu.memory_space<vmem>>, %arg5: memref<1x32xf32, #tpu.memory_space<vmem>>, %arg6: memref<32x8xf32, #tpu.memory_space<vmem>>, %arg7: memref<4x64xf32, #tpu.memory_space<vmem>>, %arg8: memref<1x64xf32, #tpu.memory_space<vmem>>, %arg9: memref<64x16xf32, #tpu.memory_space<vmem>>, %arg10: memref<8x8xf32, #tpu.memory_space<vmem>>, %arg11: memref<8x4xf32, #tpu.memory_space<vmem>>, %arg12: memref<1x6x12xf32, #tpu.memory_space<vmem>>, %arg13: memref<1x6x12xf32, #tpu.memory_space<vmem>>) attributes {dimension_semantics = [#tpu.dimension_semantics<parallel>], iteration_bounds = array<i64: 2>, scalar_prefetch = 0 : i64, scratch_operands = 0 : i64, tpu.core_type = #tpu.core_type<tc>, window_params = [{transform_indices = @transform_0, window_bounds = array<i64: 1, 6, 4>}, {pipeline_mode = #tpu.pipeline_mode<synchronous>, transform_indices = @transform_1, window_bounds = array<i64: 4, 32>}, {pipeline_mode = #tpu.pipeline_mode<synchronous>, transform_indices = @transform_2, window_bounds = array<i64: 1, 32>}, {pipeline_mode = #tpu.pipeline_mode<synchronous>, transform_indices = @transform_3, window_bounds = array<i64: 32, 32>}, {pipeline_mode = #tpu.pipeline_mode<synchronous>, transform_indices = @transform_4, window_bounds = array<i64: 1, 32>}, {pipeline_mode = #tpu.pipeline_mode<synchronous>, transform_indices = @transform_5, window_bounds = array<i64: 32, 8>}, {pipeline_mode = #tpu.pipeline_mode<synchronous>, transform_indices = @transform_6, window_bounds = array<i64: 4, 64>}, {pipeline_mode = #tpu.pipeline_mode<synchronous>, transform_indices = @transform_7, window_bounds = array<i64: 1, 64>}, {pipeline_mode = #tpu.pipeline_mode<synchronous>, transform_indices = @transform_8, window_bounds = array<i64: 64, 16>}, {pipeline_mode = #tpu.pipeline_mode<synchronous>, transform_indices = @transform_9, window_bounds = array<i64: 8, 8>}, {pipeline_mode = #tpu.pipeline_mode<synchronous>, transform_indices = @transform_10, window_bounds = array<i64: 8, 4>}, {transform_indices = @transform_11, window_bounds = array<i64: 1, 6, 12>}, {transform_indices = @transform_12, window_bounds = array<i64: 1, 6, 12>}]} {
    %c0 = arith.constant 0 : index
    %c0_0 = arith.constant 0 : index
    %c0_1 = arith.constant 0 : index
    %0 = vector.load %arg1[%c0, %c0_0, %c0_1] : memref<1x6x4xf32, #tpu.memory_space<vmem>>, vector<1x6x4xf32>
    %1 = vector.shape_cast %0 : vector<1x6x4xf32> to vector<6x4xf32>
    %c0_2 = arith.constant 0 : index
    %c0_3 = arith.constant 0 : index
    %2 = vector.load %arg2[%c0_2, %c0_3] : memref<4x32xf32, #tpu.memory_space<vmem>>, vector<4x32xf32>
    %cst = arith.constant dense<0.000000e+00> : vector<6x32xf32>
    %3 = tpu.matmul %1, %2, %cst {dimension_numbers = #tpu.dot_dimension_numbers<[1], [0], [0], [1], [0, 0, 1, 1], [], []>} : vector<6x4xf32>, vector<4x32xf32>, vector<6x32xf32> -> vector<6x32xf32>
    %c0_4 = arith.constant 0 : index
    %c0_5 = arith.constant 0 : index
    %4 = vector.load %arg3[%c0_4, %c0_5] : memref<1x32xf32, #tpu.memory_space<vmem>>, vector<1x32xf32>
    %5 = vector.broadcast %4 : vector<1x32xf32> to vector<6x32xf32>
    %6 = arith.addf %3, %5 : vector<6x32xf32>
    %cst_6 = arith.constant 0.000000e+00 : f32
    %7 = vector.broadcast %cst_6 : f32 to vector<6x32xf32>
    %8 = arith.cmpf ogt, %6, %7 : vector<6x32xf32>
    %cst_7 = arith.constant 0.00999999977 : f32
    %9 = vector.broadcast %cst_7 : f32 to vector<6x32xf32>
    %10 = arith.mulf %9, %6 : vector<6x32xf32>
    %11 = arith.select %8, %6, %10 : vector<6x32xi1>, vector<6x32xf32>
    %c0_8 = arith.constant 0 : index
    %c0_9 = arith.constant 0 : index
    %12 = vector.load %arg4[%c0_8, %c0_9] : memref<32x32xf32, #tpu.memory_space<vmem>>, vector<32x32xf32>
    %cst_10 = arith.constant dense<0.000000e+00> : vector<6x32xf32>
    %13 = tpu.matmul %11, %12, %cst_10 {dimension_numbers = #tpu.dot_dimension_numbers<[1], [0], [0], [1], [0, 0, 1, 1], [], []>} : vector<6x32xf32>, vector<32x32xf32>, vector<6x32xf32> -> vector<6x32xf32>
    %c0_11 = arith.constant 0 : index
    %c0_12 = arith.constant 0 : index
    %14 = vector.load %arg5[%c0_11, %c0_12] : memref<1x32xf32, #tpu.memory_space<vmem>>, vector<1x32xf32>
    %15 = vector.broadcast %14 : vector<1x32xf32> to vector<6x32xf32>
    %16 = arith.addf %13, %15 : vector<6x32xf32>
    %cst_13 = arith.constant 0.000000e+00 : f32
    %17 = vector.broadcast %cst_13 : f32 to vector<6x32xf32>
    %18 = arith.cmpf ogt, %16, %17 : vector<6x32xf32>
    %cst_14 = arith.constant 0.00999999977 : f32
    %19 = vector.broadcast %cst_14 : f32 to vector<6x32xf32>
    %20 = arith.mulf %19, %16 : vector<6x32xf32>
    %21 = arith.select %18, %16, %20 : vector<6x32xi1>, vector<6x32xf32>
    %c0_15 = arith.constant 0 : index
    %c0_16 = arith.constant 0 : index
    %22 = vector.load %arg6[%c0_15, %c0_16] : memref<32x8xf32, #tpu.memory_space<vmem>>, vector<32x8xf32>
    %cst_17 = arith.constant dense<0.000000e+00> : vector<6x8xf32>
    %23 = tpu.matmul %21, %22, %cst_17 {dimension_numbers = #tpu.dot_dimension_numbers<[1], [0], [0], [1], [0, 0, 1, 1], [], []>} : vector<6x32xf32>, vector<32x8xf32>, vector<6x8xf32> -> vector<6x8xf32>
    %c0_18 = arith.constant 0 : index
    %c0_19 = arith.constant 0 : index
    %c0_20 = arith.constant 0 : index
    %24 = vector.load %arg12[%c0_18, %c0_19, %c0_20] : memref<1x6x12xf32, #tpu.memory_space<vmem>>, vector<1x6x4xf32>
    %25 = vector.shape_cast %24 : vector<1x6x4xf32> to vector<6x4xf32>
    %26 = vector.shape_cast %1 : vector<6x4xf32> to vector<1x6x4xf32>
    tpu.vector_store %arg12[%c0_18, %c0_19, %c0_20], %26 {strides = array<i32>} : memref<1x6x12xf32, #tpu.memory_space<vmem>>, vector<1x6x4xf32>,
    %c0_21 = arith.constant 0 : index
    %c0_22 = arith.constant 0 : index
    %c4 = arith.constant 4 : index
    %27 = vector.load %arg12[%c0_21, %c0_22, %c4] : memref<1x6x12xf32, #tpu.memory_space<vmem>>, vector<1x6x8xf32>
    %28 = vector.shape_cast %27 : vector<1x6x8xf32> to vector<6x8xf32>
    %29 = vector.shape_cast %23 : vector<6x8xf32> to vector<1x6x8xf32>
    tpu.vector_store %arg12[%c0_21, %c0_22, %c4], %29 {strides = array<i32>} : memref<1x6x12xf32, #tpu.memory_space<vmem>>, vector<1x6x8xf32>,
    %30 = vector.extract_strided_slice %1 {offsets = [0, 0], sizes = [1, 4], strides = [1, 1]} : vector<6x4xf32> to vector<1x4xf32>
    %31 = vector.extract_strided_slice %23 {offsets = [0, 0], sizes = [1, 8], strides = [1, 1]} : vector<6x8xf32> to vector<1x8xf32>
    %c0_23 = arith.constant 0 : index
    %c0_24 = arith.constant 0 : index
    %32 = vector.load %arg7[%c0_23, %c0_24] : memref<4x64xf32, #tpu.memory_space<vmem>>, vector<4x64xf32>
    %cst_25 = arith.constant dense<0.000000e+00> : vector<1x64xf32>
    %33 = tpu.matmul %30, %32, %cst_25 {dimension_numbers = #tpu.dot_dimension_numbers<[1], [0], [0], [1], [0, 0, 1, 1], [], []>} : vector<1x4xf32>, vector<4x64xf32>, vector<1x64xf32> -> vector<1x64xf32>
    %c0_26 = arith.constant 0 : index
    %c0_27 = arith.constant 0 : index
    %34 = vector.load %arg8[%c0_26, %c0_27] : memref<1x64xf32, #tpu.memory_space<vmem>>, vector<1x64xf32>
    %35 = arith.addf %33, %34 : vector<1x64xf32>
    %cst_28 = arith.constant 0.000000e+00 : f32
    %36 = vector.broadcast %cst_28 : f32 to vector<1x64xf32>
    %37 = arith.cmpf ogt, %35, %36 : vector<1x64xf32>
    %cst_29 = arith.constant 0.00999999977 : f32
    %38 = vector.broadcast %cst_29 : f32 to vector<1x64xf32>
    %39 = arith.mulf %38, %35 : vector<1x64xf32>
    %40 = arith.select %37, %35, %39 : vector<1x64xi1>, vector<1x64xf32>
    %c0_30 = arith.constant 0 : index
    %c0_31 = arith.constant 0 : index
    %41 = vector.load %arg9[%c0_30, %c0_31] : memref<64x16xf32, #tpu.memory_space<vmem>>, vector<64x16xf32>
    %cst_32 = arith.constant dense<0.000000e+00> : vector<1x16xf32>
    %42 = tpu.matmul %40, %41, %cst_32 {dimension_numbers = #tpu.dot_dimension_numbers<[1], [0], [0], [1], [0, 0, 1, 1], [], []>} : vector<1x64xf32>, vector<64x16xf32>, vector<1x16xf32> -> vector<1x16xf32>
    %43 = vector.extract_strided_slice %42 {offsets = [0, 0], sizes = [1, 8], strides = [1, 1]} : vector<1x16xf32> to vector<1x8xf32>
    %44 = vector.extract_strided_slice %42 {offsets = [0, 8], sizes = [1, 8], strides = [1, 1]} : vector<1x16xf32> to vector<1x8xf32>
    %45 = tpu.iota {dimensions = array<i32: 0>} : vector<6x1xi32>
    %46 = arith.sitofp %45 : vector<6x1xi32> to vector<6x1xf32>
    %cst_33 = arith.constant 1.000000e-01 : f32
    %47 = vector.broadcast %cst_33 : f32 to vector<1x8xf32>
    %48 = arith.mulf %43, %47 : vector<1x8xf32>
    %49 = vector.broadcast %46 : vector<6x1xf32> to vector<6x8xf32>
    %50 = vector.broadcast %48 : vector<1x8xf32> to vector<6x8xf32>
    %51 = arith.mulf %49, %50 : vector<6x8xf32>
    %52 = math.exp %51 : vector<6x8xf32>
    %cst_34 = arith.constant 1.000000e-01 : f32
    %53 = vector.broadcast %cst_34 : f32 to vector<1x8xf32>
    %54 = arith.mulf %44, %53 : vector<1x8xf32>
    %55 = vector.broadcast %46 : vector<6x1xf32> to vector<6x8xf32>
    %56 = vector.broadcast %54 : vector<1x8xf32> to vector<6x8xf32>
    %57 = arith.mulf %55, %56 : vector<6x8xf32>
    %58 = math.cos %57 : vector<6x8xf32>
    %59 = arith.mulf %58, %52 : vector<6x8xf32>
    %60 = math.sin %57 : vector<6x8xf32>
    %61 = arith.mulf %60, %52 : vector<6x8xf32>
    %c0_35 = arith.constant 0 : index
    %c0_36 = arith.constant 0 : index
    %62 = vector.load %arg10[%c0_35, %c0_36] : memref<8x8xf32, #tpu.memory_space<vmem>>, vector<8x8xf32>
    %cst_37 = arith.constant dense<0.000000e+00> : vector<1x8xf32>
    %63 = tpu.matmul %31, %62, %cst_37 {dimension_numbers = #tpu.dot_dimension_numbers<[1], [0], [0], [1], [0, 0, 1, 1], [], []>} : vector<1x8xf32>, vector<8x8xf32>, vector<1x8xf32> -> vector<1x8xf32>
    %64 = vector.broadcast %31 : vector<1x8xf32> to vector<6x8xf32>
    %65 = arith.mulf %64, %59 : vector<6x8xf32>
    %66 = vector.broadcast %63 : vector<1x8xf32> to vector<6x8xf32>
    %67 = arith.mulf %66, %61 : vector<6x8xf32>
    %68 = arith.addf %65, %67 : vector<6x8xf32>
    %c0_38 = arith.constant 0 : index
    %c0_39 = arith.constant 0 : index
    %69 = vector.load %arg11[%c0_38, %c0_39] : memref<8x4xf32, #tpu.memory_space<vmem>>, vector<8x4xf32>
    %cst_40 = arith.constant dense<0.000000e+00> : vector<6x4xf32>
    %70 = tpu.matmul %68, %69, %cst_40 {dimension_numbers = #tpu.dot_dimension_numbers<[1], [0], [0], [1], [0, 0, 1, 1], [], []>} : vector<6x8xf32>, vector<8x4xf32>, vector<6x4xf32> -> vector<6x4xf32>
    %c0_i32 = arith.constant 0 : i32
    %71 = vector.broadcast %c0_i32 : i32 to vector<6x1xi32>
    %72 = arith.cmpi eq, %45, %71 : vector<6x1xi32>
    %73 = vector.shape_cast %72 : vector<6x1xi1> to vector<6x1xi1>
    %74 = vector.broadcast %73 : vector<6x1xi1> to vector<6x4xi1>
    %75 = vector.shape_cast %30 : vector<1x4xf32> to vector<1x4xf32>
    %76 = vector.broadcast %75 : vector<1x4xf32> to vector<6x4xf32>
    %77 = arith.select %74, %76, %70 : vector<6x4xi1>, vector<6x4xf32>
    %c0_41 = arith.constant 0 : index
    %c0_42 = arith.constant 0 : index
    %c0_43 = arith.constant 0 : index
    %78 = vector.load %arg13[%c0_41, %c0_42, %c0_43] : memref<1x6x12xf32, #tpu.memory_space<vmem>>, vector<1x6x4xf32>
    %79 = vector.shape_cast %78 : vector<1x6x4xf32> to vector<6x4xf32>
    %80 = vector.shape_cast %77 : vector<6x4xf32> to vector<1x6x4xf32>
    tpu.vector_store %arg13[%c0_41, %c0_42, %c0_43], %80 {strides = array<i32>} : memref<1x6x12xf32, #tpu.memory_space<vmem>>, vector<1x6x4xf32>,
    %c0_44 = arith.constant 0 : index
    %c0_45 = arith.constant 0 : index
    %c4_46 = arith.constant 4 : index
    %81 = vector.load %arg13[%c0_44, %c0_45, %c4_46] : memref<1x6x12xf32, #tpu.memory_space<vmem>>, vector<1x6x8xf32>
    %82 = vector.shape_cast %81 : vector<1x6x8xf32> to vector<6x8xf32>
    %83 = vector.shape_cast %68 : vector<6x8xf32> to vector<1x6x8xf32>
    tpu.vector_store %arg13[%c0_44, %c0_45, %c4_46], %83 {strides = array<i32>} : memref<1x6x12xf32, #tpu.memory_space<vmem>>, vector<1x6x8xf32>,
    return
  }
  func.func @transform_0(%arg0: i32) -> (i32, i32, i32) {
    %c0_i32 = arith.constant 0 : i32
    %c0_i32_0 = arith.constant 0 : i32
    %c0_i32_1 = arith.constant 0 : i32
    return %arg0, %c0_i32, %c0_i32_0 : i32, i32, i32
  }
  func.func @transform_1(%arg0: i32) -> (i32, i32) {
    %c0_i32 = arith.constant 0 : i32
    %c0_i32_0 = arith.constant 0 : i32
    %c0_i32_1 = arith.constant 0 : i32
    return %c0_i32, %c0_i32_0 : i32, i32
  }
  func.func @transform_2(%arg0: i32) -> (i32, i32) {
    %c0_i32 = arith.constant 0 : i32
    %c0_i32_0 = arith.constant 0 : i32
    %c0_i32_1 = arith.constant 0 : i32
    return %c0_i32, %c0_i32_0 : i32, i32
  }
  func.func @transform_3(%arg0: i32) -> (i32, i32) {
    %c0_i32 = arith.constant 0 : i32
    %c0_i32_0 = arith.constant 0 : i32
    %c0_i32_1 = arith.constant 0 : i32
    return %c0_i32, %c0_i32_0 : i32, i32
  }
  func.func @transform_4(%arg0: i32) -> (i32, i32) {
    %c0_i32 = arith.constant 0 : i32
    %c0_i32_0 = arith.constant 0 : i32
    %c0_i32_1 = arith.constant 0 : i32
    return %c0_i32, %c0_i32_0 : i32, i32
  }
  func.func @transform_5(%arg0: i32) -> (i32, i32) {
    %c0_i32 = arith.constant 0 : i32
    %c0_i32_0 = arith.constant 0 : i32
    %c0_i32_1 = arith.constant 0 : i32
    return %c0_i32, %c0_i32_0 : i32, i32
  }
  func.func @transform_6(%arg0: i32) -> (i32, i32) {
    %c0_i32 = arith.constant 0 : i32
    %c0_i32_0 = arith.constant 0 : i32
    %c0_i32_1 = arith.constant 0 : i32
    return %c0_i32, %c0_i32_0 : i32, i32
  }
  func.func @transform_7(%arg0: i32) -> (i32, i32) {
    %c0_i32 = arith.constant 0 : i32
    %c0_i32_0 = arith.constant 0 : i32
    %c0_i32_1 = arith.constant 0 : i32
    return %c0_i32, %c0_i32_0 : i32, i32
  }
  func.func @transform_8(%arg0: i32) -> (i32, i32) {
    %c0_i32 = arith.constant 0 : i32
    %c0_i32_0 = arith.constant 0 : i32
    %c0_i32_1 = arith.constant 0 : i32
    return %c0_i32, %c0_i32_0 : i32, i32
  }
  func.func @transform_9(%arg0: i32) -> (i32, i32) {
    %c0_i32 = arith.constant 0 : i32
    %c0_i32_0 = arith.constant 0 : i32
    %c0_i32_1 = arith.constant 0 : i32
    return %c0_i32, %c0_i32_0 : i32, i32
  }
  func.func @transform_10(%arg0: i32) -> (i32, i32) {
    %c0_i32 = arith.constant 0 : i32
    %c0_i32_0 = arith.constant 0 : i32
    %c0_i32_1 = arith.constant 0 : i32
    return %c0_i32, %c0_i32_0 : i32, i32
  }
  func.func @transform_11(%arg0: i32) -> (i32, i32, i32) {
    %c0_i32 = arith.constant 0 : i32
    %c0_i32_0 = arith.constant 0 : i32
    %c0_i32_1 = arith.constant 0 : i32
    return %arg0, %c0_i32, %c0_i32_0 : i32, i32, i32
  }
  func.func @transform_12(%arg0: i32) -> (i32, i32, i32) {
    %c0_i32 = arith.constant 0 : i32
    %c0_i32_0 = arith.constant 0 : i32
    %c0_i32_1 = arith.constant 0 : i32
    return %arg0, %c0_i32, %c0_i32_0 : i32, i32, i32
  }
}

</mosaic_0001>

<bundles_post_ra>
// kernel: denis_jbf_forward.1
= control target key start
LH: loop header
LB: loop body
LE: loop exit
PB: predicated region body
PF: predicated region fallthrough
CT: control target
= control target key end

     0   :  { %s1587_s21 = smov 0   ;;  %s1769_s0 = inlined_call_operand.vmem [shape: f32[2,6,4], index: 0, kind: input, shape index: {}]   ;;  %s1770_s1 = inlined_call_operand.vmem [shape: f32[4,32], index: 1, kind: input, shape index: {}]   ;;  %s1771_s2 = inlined_call_operand.vmem [shape: f32[1,32], index: 2, kind: input, shape index: {}]   ;;  %s1772_s3 = inlined_call_operand.vmem [shape: f32[32,32], index: 3, kind: input, shape index: {}]   ;;  %s1773_s4 = inlined_call_operand.vmem [shape: f32[1,32], index: 4, kind: input, shape index: {}]   ;;  %s1774_s5 = inlined_call_operand.vmem [shape: f32[32,8], index: 5, kind: input, shape index: {}]   ;;  %s1775_s6 = inlined_call_operand.vmem [shape: f32[4,64], index: 6, kind: input, shape index: {}]   ;;  %s1776_s7 = inlined_call_operand.vmem [shape: f32[1,64], index: 7, kind: input, shape index: {}]   ;;  %s1777_s8 = inlined_call_operand.vmem [shape: f32[64,16], index: 8, kind: input, shape index: {}]   ;;  %s1778_s9 = inlined_call_operand.vmem [shape: f32[8,8], index: 9, kind: input, shape index: {}]   ;;  %s1779_s10 = inlined_call_operand.vmem [shape: f32[8,4], index: 10, kind: input, shape index: {}]   ;;  %s1780_s11 = inlined_call_operand.vmem [shape: f32[2,6,12], index: 11, kind: output, shape index: {0}]   ;;  %s1781_s12 = inlined_call_operand.vmem [shape: f32[2,6,12], index: 12, kind: output, shape index: {1}]  }
   0x1 LB: > { %s1331_s22 = sadd.s32 4294967295, %s1508_s21   ;;  %p1335_p0 = scmp.ge.s32.totalorder %s1508_s21, 1  ;;  %s1508_s21 = sphi %s1587_s21, %s23_s21  }
   0x2   : > { %p364_p1 = scmp.lt.s32.totalorder %s1508_s21, 3 }
   0x4   : > { %p365_p2 = pnand %p1335_p0, %p364_p1 }
   0x5   : > { %v421_v0 = vld [vmem:[%s1770_s1] sm:$0xf] (!%p365_p2)  ;;  %vm433_vm0 = vcmask (!%p365_p2), 1043456   ;;  %p408_p3 = scmp.lt.s32.totalorder (!%p365_p2), %s1331_s22, 1  ;;  %v1510_v1 = vmov (!%p365_p2), 0.0   ;;  %vm1511_vm1 = vmmov (!%p365_p2), 0   ;;  %v843_v50 = vlaneseq (!%p365_p2) }
   0x6   : > { %368 = sbr.rel (%p365_p2) target bundleno = 1149 (0x47d), region = 64  ;;  %1387 = vmatprep.subr.mxu1 (!%p365_p2), %v1510_v1  ;;  %1389 = vmatprep.mubr.msk.f32.mxu1 (!%p365_p2), %vm1511_vm1, %v1510_v1  ;;  %v510_v2 = vld [vmem:[%s1772_s3] sm:$0xff] (!%p365_p2)  ;;  %v511_v3 = vld [vmem:[%s1772_s3 + $0x8] sm:$0xff] (!%p365_p2)  ;;  %v1512_v4 = vmov (!%p365_p2), 0.0|0.0   ;;  %vm429_vm2 = vcmask (!%p365_p2), 31744   ;;  %v512_v7 = vld [vmem:[%s1772_s3 + $0x10] sm:$0xff] (!%p365_p2) }
   0x7   : > { %1388 = vmatpush3.msk.msra.mxu1 (!%p365_p2), %vm433_vm0, %v421_v0  ;;  %1454 = vmatprep.subr.bf16.mxu0 (!%p365_p2), %v1512_v4  ;;  %v1449_v5 = vpack.c.bf16 (!%p365_p2), %v511_v3, %v510_v2  ;;  %v513_v8 = vld [vmem:[%s1772_s3 + $0x18] sm:$0xff] (!%p365_p2)  ;;  %v598_v10 = vld [vmem:[%s1774_s5] sm:$0xff] (!%p365_p2)  ;;  %v599_v11 = vld [vmem:[%s1774_s5 + $0x8] sm:$0xff] (!%p365_p2)  ;;  %vm521_vm4 = vcmask (!%p365_p2), 261120   ;;  %vm769_vm7 = vcmask (!%p365_p2), 523264   ;;  %vm1068_vm8 = vcmask (!%p365_p2), 64512  }
   0x8   : > { %1448 = vmatprep.subr.bf16.mxu1 (!%p365_p2), %v1512_v4  ;;  %1411 = vmatprep.mubr.msk.f32.mxu0 (!%p365_p2), %vm1511_vm1, %v1510_v1  ;;  %v1452_v9 = vpack.c.bf16 (!%p365_p2), %v513_v8, %v512_v7  ;;  %v1455_v12 = vpack.c.bf16 (!%p365_p2), %v599_v11, %v598_v10  ;;  %v1339_v13 = vld [vmem:[%s1771_s2] ss:$0 sm:$0xff] (!%p365_p2)  ;;  %v600_v20 = vld [vmem:[%s1774_s5 + $0x10] sm:$0xff] (!%p365_p2)  ;;  %v601_v21 = vld [vmem:[%s1774_s5 + $0x18] sm:$0xff] (!%p365_p2)  ;;  %v1707_v51 = vshrl.u32 (!%p365_p2), %v843_v50, 7  ;;  %s1520_s28 = smov (!%p365_p2), 120  }
   0x9   : > { %v683_v18 = vld [vmem:[%s1775_s6] sm:$0xf] (!%p365_p2)  ;;  %v1458_v22 = vpack.c.bf16 (!%p365_p2), %v601_v21, %v600_v20  ;;  %v762_v26 = vld [vmem:[%s1777_s8 + $0x8] sm:$0xff] (!%p365_p2)  ;;  %v763_v31 = vld [vmem:[%s1777_s8 + $0x10] sm:$0xff] (!%p365_p2)  ;;  %v1514_v8 = vmov (!%p365_p2), 683565275  }
   0xa   : > { %1456 = vmatpush3.bf16.msra.mxu0 (!%p365_p2), %v1455_v12  ;;  %v1342_v23 = vld [vmem:[%s1773_s4] ss:$0 sm:$0xff] (!%p365_p2)  ;;  %v764_v32 = vld [vmem:[%s1777_s8 + $0x18] sm:$0xff] (!%p365_p2)  ;;  %v766_v38 = vld [vmem:[%s1777_s8 + $0x28] sm:$0xff] (!%p365_p2)  ;;  %v845_v53 = vcvt.s32.f32 (!%p365_p2), %v1707_v51  ;;  %v1711_v55 = vsub.s32 (!%p365_p2), 0, %v1707_v51  ;;  %s1521_s30 = smov (!%p365_p2), 4  }
   0xb   : > { %1457 = vmatprep.subr.bf16.mxu0 (!%p365_p2), %v1512_v4  ;;  %v761_v25 = vld [vmem:[%s1777_s8] sm:$0xff] (!%p365_p2)  ;;  %v1464_v36 = vpack.c.bf16 (!%p365_p2), %v764_v32, %v763_v31  ;;  %v767_v41 = vld [vmem:[%s1777_s8 + $0x30] sm:$0xff] (!%p365_p2)  ;;  %v768_v42 = vld [vmem:[%s1777_s8 + $0x38] sm:$0xff] (!%p365_p2)  ;;  %v1515_v10 = vmov (!%p365_p2), 2475754826  }
   0xc   : > { %v1461_v30 = vpack.c.bf16 (!%p365_p2), %v762_v26, %v761_v25  ;;  %v765_v37 = vld [vmem:[%s1777_s8 + $0x20] sm:$0xff] (!%p365_p2)  ;;  %v1470_v44 = vpack.c.bf16 (!%p365_p2), %v768_v42, %v767_v41 }
   0xd   : > { %s1785_s22 = smov (!%p408_p3, %s1331_s22), 1  ;;  %v684_v39 = vld [vmem:[%s1776_s7] sm:$0x1]  ;;  %v1467_v40 = vpack.c.bf16 %v766_v38, %v765_v37 }
   0xe   : > { %s1612_s29 = sshll.u32 %s1785_s22, 3  ;;  %1459 = vmatpush3.bf16.msra.mxu0 %v1458_v22  ;;  %v1067_v47 = vld [vmem:[%s1778_s9] sm:$0xff]  ;;  %s1513_s22 = smov 8   ;;  %v1519_v22 = vmov 1326507024  }
   0xf   : > { %s411_s14 = scalar_lea.vmem %s1769_s0, %s1612_s29  ;;  %1460 = vmatprep.subr.bf16.mxu0 %v1512_v4  ;;  %s415_s27 = scalar_lea.vmem %s1780_s11, %s1612_s29 }
  0x10   : > { %v1618_v6 = vld [vmem:[%s411_s14] sm:$0x3f]  ;;  %s419_s15 = scalar_lea.vmem %s1781_s12, %s1612_s29 }
  0x11   : > { %1390 = vmatmul.mubr.msk.f32.vlgmr.msra.gmra.mrb[0].mxu1 %vm429_vm2, %v1618_v6 }
  0x12   : > { %1450 = vmatpush3.bf16.msra.mxu1 %v1449_v5  ;;  %1400 = vmatprep.mubr.msk.f32.mxu1 %vm1511_vm1, %v1510_v1 }
  0x13   : > { %1451 = vmatprep.subr.bf16.mxu1 %v1512_v4 }
  0x16   : > { %1453 = vmatpush3.bf16.msra.mxu1 %v1452_v9 }
  0x17   : > { %1414 = vmatprep.subr.mxu1 %v1510_v1 }
  0xe4   : > { %v503_v14 = vpop.f32.mrb[0].mxu1 }
  0xe5   : > { %v504_v15 = vadd.f32 %v1339_v13, %v503_v14  ;;  %v1391_v16 = vpop.f32.mrb[1].mxu1  ;;  %v1516_v13 = vmov 2131351028  }
  0xe6   : > { %v1517_v16 = vmov 2102212464  }
  0xe7   : > { %vm507_vm3 = vcmp.gt.f32.partialorder %v504_v15, 0.0  ;;  %v508_v17 = vmul.f32 0.01, %v504_v15 }
  0xe9   : > { %v509_v19 = vsel %vm507_vm3, %v504_v15, %v508_v17 }
  0xea   : > { %1401 = vmatmul.mubr.msk.f32.vlgmr.msra.gmra.mrb[2].mxu1 %vm521_vm4, %v509_v19  ;;  %v1518_v19 = vmov 920167782  }
  0xeb   : > { %1415 = vmatpush3.msk.msra.mxu1 %vm433_vm0, %v683_v18  ;;  %1416 = vmatprep.mubr.msk.f32.mxu1 %vm1511_vm1, %v1510_v1 }
  0xec   : > { %1438 = vmatprep.subr.mxu1 %v1510_v1 }
  0xee   : > { %1417 = vmatmul.mubr.msk.f32.vlgmr.msra.gmra.mrb[4].mxu1 %vm429_vm2, %v1618_v6 }
  0xef   : > { %1440 = vmatprep.mubr.msk.f32.mxu1 %vm1511_vm1, %v1510_v1  ;;  %1439 = vmatpush3.msra.mxu1 %v1067_v47 }
  0xf0   : > { %1443 = vmatprep.subr.mxu1 %v1510_v1 }
 0x1bd   : > { %v591_v24 = vpop.f32.mrb[2].mxu1 }
 0x1be   : > { %v592_v27 = vadd.f32 %v1342_v23, %v591_v24  ;;  %v1402_v28 = vpop.f32.mrb[3].mxu1 }
 0x1c0   : > { %vm595_vm5 = vcmp.gt.f32.partialorder %v592_v27, 0.0  ;;  %v596_v29 = vmul.f32 0.01, %v592_v27 }
 0x1c1   : > { %v754_v33 = vpop.f32.mrb[4].mxu1 }
 0x1c2   : > { %v597_v34 = vsel %vm595_vm5, %v592_v27, %v596_v29  ;;  %v1418_v35 = vpop.f32.mrb[5].mxu1  ;;  %v755_v43 = vadd.f32 %v754_v33, %v684_v39 }
 0x1c3   : > { %1412 = vmatmul.mubr.msk.f32.vlgmr.msra.gmra.mrb[0].mxu0 %vm521_vm4, %v597_v34 }
 0x1c4   : > { %1462 = vmatpush3.bf16.msra.mxu0 %v1461_v30  ;;  %1435 = vmatprep.mubr.msk.f32.mxu0 %vm1511_vm1, %v1510_v1  ;;  %v759_v45 = vmul.f32 0.01, %v755_v43  ;;  %vm758_vm6 = vcmp.gt.f32.partialorder %v755_v43, 0.0 }
 0x1c5   : > { %1463 = vmatprep.subr.bf16.mxu0 %v1512_v4 }
 0x1c6   : > { %v760_v46 = vsel %vm758_vm6, %v755_v43, %v759_v45 }
 0x1c8   : > { %1465 = vmatpush3.bf16.msra.mxu0 %v1464_v36 }
 0x1c9   : > { %1466 = vmatprep.subr.bf16.mxu0 %v1512_v4 }
 0x1cc   : > { %1468 = vmatpush3.bf16.msra.mxu0 %v1467_v40 }
 0x1cd   : > { %1469 = vmatprep.subr.bf16.mxu0 %v1512_v4 }
 0x1d0   : > { %1471 = vmatpush3.bf16.msra.mxu0 %v1470_v44 }
 0x1d3   : > { %1436 = vmatmul.mubr.msk.f32.vlgmr.msra.gmra.mrb[2].mxu0 %vm769_vm7, %v760_v46 }
 0x296   : > { %v1701_v48 = vpop.f32.mrb[0].mxu0 }
 0x297   : > { %v1413_v49 = vpop.f32.mrb[1].mxu0  ;;  %1441 = vmatmul.mubr.msk.f32.vlgmr.msra.gmra.mrb[6].mxu1 %vm1068_vm8, %v1701_v48 }
 0x298   : > { %1445 = vmatprep.mubr.msk.f32.mxu1 %vm1511_vm1, %v1510_v1 }
 0x2a6   : > { %v839_v52 = vpop.f32.mrb[2].mxu0 }
 0x2a7   : > { %v846_v54 = vmul.f32 0.1, %v839_v52  ;;  %v1437_v56 = vpop.f32.mrb[3].mxu0 }
 0x2a9   : > { %v850_v57 = vrot.slane %v846_v54, %v1711_v55 }
 0x2ab   : > { %v1714_v58 = vmul.f32 %v850_v57, %v845_v53 }
 0x2ad   : > { %v857_v59 = vand.u32 2139095040, %v1714_v58  ;;  %v852_v60 = vmul.f32 1.442695, %v1714_v58  ;;  %v854_v0 = vand.u32 2147483647, %v1714_v58  ;;  %vm856_vm15 = vcmp.lt.s32.totalorder %v1714_v58, 0 }
 0x2af   : > { %v858_v61 = vshrl.u32 %v857_v59, 23  ;;  %1496 = vpow2.f32 %v852_v60  ;;  %v861_v5 = vand.u32 8388607, %v854_v0  ;;  %vm1729_vm0 = vcmp.le.f32.partialorder %v854_v0, 0.7853982 }
 0x2b1   : > { %v1348_v62 = vadd.s32 4294967169, %v858_v61  ;;  %v862_v24 = vor.u32 8388608, %v861_v5 }
 0x2b3   : > { %v864_v63 = vadd.s32 1, %v1348_v62  ;;  %v902_v38 = vshll.u32 %v862_v24, 8 }
 0x2b5   : > { %vm865_vm9 = vcmp.gt.s32.totalorder %v864_v63, 0 }
 0x2b6   : > { %v866_v1 = vsel %vm865_vm9, %v864_v63, 0  ;;  %vm946_vm9 = vweird.f32 %v1714_v58 }
 0x2b7   : > { %v868_v2 = vand.u32 31, %v866_v1  ;;  %v867_v7 = vshrl.u32 %v866_v1, 5 }
 0x2b9   : > { %v1497_v3 = vpop.eup %1496  ;;  %v869_v4 = vsub.s32 32, %v868_v2  ;;  %v871_v9 = vshll.u32 %v1514_v8, %v868_v2  ;;  %v874_v11 = vshll.u32 %v1515_v10, %v868_v2  ;;  %v877_v15 = vshll.u32 %v1516_v13, %v868_v2 }
 0x2ba   : > { %958 = vrot.lane.b32.xlu0 %v1497_v3, %s1513_s22  ;;  %v880_v18 = vshll.u32 %v1517_v16, %v868_v2  ;;  %v883_v21 = vshll.u32 %v1518_v19, %v868_v2  ;;  %vm886_vm10 = vcmp.lt.s32.totalorder %v867_v7, 1  ;;  %vm889_vm11 = vcmp.lt.s32.totalorder %v867_v7, 4 }
 0x2bb   : > { %v872_v12 = vshrl.u32 %v1515_v10, %v869_v4  ;;  %v875_v14 = vshrl.u32 %v1516_v13, %v869_v4  ;;  %v878_v17 = vshrl.u32 %v1517_v16, %v869_v4  ;;  %v881_v20 = vshrl.u32 %v1518_v19, %v869_v4 }
 0x2bc   : > { %v884_v23 = vshrl.u32 %v1519_v22, %v869_v4  ;;  %v870_v33 = vshrl.u32 %v1514_v8, %v869_v4  ;;  %vm888_vm12 = vcmp.lt.s32.totalorder %v867_v7, 3  ;;  %vm887_vm13 = vcmp.lt.s32.totalorder %v867_v7, 2 }
 0x2bd   : > { %v873_v25 = vor.u32 %v872_v12, %v871_v9  ;;  %v876_v26 = vor.u32 %v875_v14, %v874_v11  ;;  %v879_v27 = vor.u32 %v878_v17, %v877_v15  ;;  %v882_v28 = vor.u32 %v881_v20, %v880_v18 }
 0x2be   : > { %v885_v29 = vor.u32 %v884_v23, %v883_v21 }
 0x2bf   : > { %v891_v30 = vsel %vm889_vm11, %v879_v27, 2102212464  ;;  %v894_v31 = vsel %vm886_vm10, %v873_v25, %v876_v26  ;;  %v898_v32 = vsel %vm886_vm10, %v876_v26, %v879_v27  ;;  %v895_v34 = vsel %vm889_vm11, %v882_v28, 920167782 }
 0x2c0   : > { %v899_v35 = vsel %vm889_vm11, %v885_v29, 1326507024  ;;  %v896_v36 = vsel %vm888_vm12, %v879_v27, %v895_v34  ;;  %v890_v39 = vsel %vm886_vm10, %v870_v33, %v873_v25  ;;  %v892_v40 = vsel %vm888_vm12, %v876_v26, %v891_v30 }
 0x2c1   : > { %v900_v37 = vsel %vm888_vm12, %v882_v28, %v899_v35  ;;  %v897_v41 = vsel %vm887_vm13, %v894_v31, %v896_v36  ;;  %v893_v47 = vsel %vm887_vm13, %v890_v39, %v892_v40  ;;  %v1160_v36 = vld [vmem:[%s1779_s10] sm:$0xff]  ;;  %vm675_vm10 = vcmask 29696  }
 0x2c2   : > { %v901_v42 = vsel %vm887_vm13, %v898_v32, %v900_v37  ;;  %v1722_v45 = vmul.u32.u64.low %v902_v38, %v897_v41  ;;  %v1723_v46 = vmul.u32.u64.high %v902_v38, %v897_v41, %v1722_v45  ;;  %v909_v50 = vmul.u32 %v902_v38, %v893_v47  ;;  %1444 = vmatpush3.msra.mxu1 %v1160_v36  ;;  %676 = vst.msk [vmem:[%s415_s27] sm:$0x3f] %vm675_vm10, %v1618_v6 }
 0x2c3   : > { %v1719_v43 = vmul.u32.u64.low %v902_v38, %v901_v42  ;;  %v1720_v44 = vmul.u32.u64.high %v902_v38, %v901_v42, %v1719_v43  ;;  %v1144_v42 = vrot.slane %v1701_v48, %v1711_v55  ;;  %vm681_vm11 = vcmask 95264  }
 0x2c4   : > { %v912_v49 = vadd.s32 1, %v1723_v46  ;;  %vm1234_vm12 = vcmp.eq.s32.totalorder %v1707_v51, 0 }
 0x2c5   : > { %vm911_vm14 = vc.u32 %v1720_v44, %v1722_v45  ;;  %v910_v7 = vadd.s32 %v1722_v45, %v1720_v44 }
 0x2c6   : > { %v913_v52 = vsel %vm911_vm14, %v912_v49, %v1723_v46 }
 0x2c7   : > { %v914_v53 = vadd.s32 %v913_v52, %v909_v50  ;;  %v1240_v50 = vrot.slane %v1618_v6, %v1711_v55 }
 0x2c9   : > { %v915_v54 = vadd.s32 536870912, %v914_v53 }
 0x2cb   : > { %v916_v56 = vshrl.u32 %v915_v54, 30 }
 0x2cd   : > { %v917_v57 = vshll.u32 %v916_v56, 30  ;;  %v940_v59 = vsub.s32 4, %v916_v56 }
 0x2cf   : > { %v918_v61 = vsub.s32 %v914_v53, %v917_v57  ;;  %v941_v62 = vsel %vm856_vm15, %v940_v59, %v916_v56 }
 0x2d0   : > { %v943_v63 = vsel %vm1729_vm0, 0, %v941_v62 }
 0x2d1   : > { %v920_v1 = vsub.s32 0, %v918_v61  ;;  %v1055_v21 = vadd.s32 3, %v943_v63  ;;  %v947_v22 = vand.u32 3, %v943_v63 }
 0x2d3   : > { %v1349_v2 = vmin.u32 %v920_v1, %v918_v61  ;;  %v1056_v23 = vand.u32 3, %v1055_v21  ;;  %vm952_vm2 = vcmp.eq.s32.totalorder %v947_v22, 2  ;;  %vm949_vm4 = vcmp.eq.s32.totalorder %v947_v22, 0 }
 0x2d4   : > { %vm948_vm6 = vcmp.lt.s32.totalorder %v947_v22, 2 }
 0x2d5   : > { %v922_v3 = vclz %v1349_v2  ;;  %vm1061_vm3 = vcmp.eq.s32.totalorder %v1056_v23, 2  ;;  %vm1058_vm5 = vcmp.eq.s32.totalorder %v1056_v23, 0  ;;  %vm1057_vm7 = vcmp.lt.s32.totalorder %v1056_v23, 2 }
 0x2d7   : > { %v1350_v4 = vadd.s32 4294967294, %v922_v3 }
 0x2d9   : > { %vm1351_vm1 = vcmp.lt.s32.totalorder %v1350_v4, 0 }
 0x2da   : > { %v925_v5 = vsel %vm1351_vm1, 0, %v1350_v4 }
 0x2db   : > { %v926_v8 = vsub.s32 32, %v925_v5  ;;  %v930_v0 = vsub.s32 4294967266, %v925_v5  ;;  %v927_v9 = vshll.u32 %v918_v61, %v925_v5 }
 0x2dd   : > { %v928_v10 = vshrl.u32 %v910_v7, %v926_v8  ;;  %v931_v11 = vadd.s32 127, %v930_v0 }
 0x2df   : > { %v929_v12 = vor.u32 %v928_v10, %v927_v9  ;;  %v932_v13 = vshll.u32 %v931_v11, 23 }
 0x2e1   : > { %v933_v14 = vor.u32 4788187, %v932_v13  ;;  %v936_v16 = vcvt.s32.f32 %v929_v12 }
 0x2e3   : > { %v934_v15 = vand.u32 2147483647, %v933_v14 }
 0x2e5   : > { %v937_v17 = vmul.f32 %v936_v16, %v934_v15 }
 0x2e7   : > { %v938_v18 = vxor.u32 2147483648, %v937_v17 }
 0x2e9   : > { %v939_v19 = vsel %vm856_vm15, %v938_v18, %v937_v17 }
 0x2ea   : > { %v942_v20 = vsel %vm1729_vm0, %v1714_v58, %v939_v19 }
 0x2eb   : > { %1498 = vcosq.f32 %v942_v20 }
 0x2ec   : > { %1500 = vsinq.f32 %v942_v20 }
 0x2f5   : > { %v1499_v24 = vpop.eup %1498 }
 0x2f6   : > { %v1501_v25 = vpop.eup %1500  ;;  %v953_v26 = vxor.u32 2147483648, %v1499_v24 }
 0x2f7   : > { %v950_v27 = vxor.u32 2147483648, %v1501_v25 }
 0x2f8   : > { %v954_v28 = vsel %vm952_vm2, %v953_v26, %v1501_v25  ;;  %v1063_v29 = vsel %vm1061_vm3, %v953_v26, %v1501_v25 }
 0x2f9   : > { %v951_v30 = vsel %vm949_vm4, %v1499_v24, %v950_v27  ;;  %v1060_v31 = vsel %vm1058_vm5, %v1499_v24, %v950_v27 }
 0x2fa   : > { %v955_v32 = vsel %vm948_vm6, %v951_v30, %v954_v28  ;;  %v1064_v33 = vsel %vm1057_vm7, %v1060_v31, %v1063_v29 }
 0x2fb   : > { %v956_v34 = vsel %vm946_vm9, nan, %v955_v32  ;;  %v1065_v35 = vsel %vm946_vm9, nan, %v1064_v33 }
 0x32c   : > { %v959_v37 = vpop.permute.xlu0 %958 }
 0x32d   : > { %v961_v38 = vmul.f32 %v959_v37, %v956_v34  ;;  %v1066_v58 = vmul.f32 %v1065_v35, %v959_v37 }
 0x32f   : > { %1146 = vrot.lane.b32.xlu0 %v961_v38, %s1520_s28  ;;  %1155 = vrot.lane.b32.xlu1 %v1066_v58, %s1520_s28 }
 0x333   : > { %678 = vrot.lane.b32.xlu1 %v1701_v48, %s1521_s30 }
 0x36a   : > { %v1137_v39 = vpop.f32.mrb[6].mxu1 }
 0x36b   : > { %v1442_v40 = vpop.f32.mrb[7].mxu1  ;;  %v1153_v41 = vrot.slane %v1137_v39, %v1711_v55 }
 0x3a1   : > { %v1147_v43 = vpop.permute.xlu0 %1146  ;;  %v1156_v44 = vpop.permute.xlu1 %1155 }
 0x3a2   : > { %v1149_v45 = vmul.f32 %v1147_v43, %v1144_v42  ;;  %v1158_v46 = vmul.f32 %v1156_v44, %v1153_v41 }
 0x3a4   : > { %v1159_v47 = vadd.f32 %v1158_v46, %v1149_v45 }
 0x3a5   : > { %v679_v49 = vpop.permute.xlu1 %678 }
 0x3a6   : > { %682 = vst.msk [vmem:[%s415_s27] sm:$0x3f] %vm681_vm11, %v679_v49  ;;  %1243 = vrot.lane.b32.xlu0 %v1159_v47, %s1521_s30  ;;  %1446 = vmatmul.mubr.msk.f32.vlgmr.msra.gmra.mrb[8].mxu1 %vm1068_vm8, %v1159_v47 }
 0x418   : > { %v1244_v54 = vpop.permute.xlu0 %1243 }
 0x479   : > { %v1230_v48 = vpop.f32.mrb[8].mxu1 }
 0x47a   : > { %v1241_v52 = vsel %vm1234_vm12, %v1240_v50, %v1230_v48  ;;  %v1447_v53 = vpop.f32.mrb[9].mxu1 }
 0x47b   : > { %1242 = vst.msk [vmem:[%s419_s15] sm:$0x3f] %vm675_vm10, %v1241_v52 }
 0x47c   : > { %1246 = vst.msk [vmem:[%s419_s15] sm:$0x3f] %vm681_vm11, %v1244_v54 }
 0x47d PF: > { %s23_s21 = sadd.s32 1, %s1508_s21  }
 0x47e   : > { %p20_p4 = scmp.ge.s32.totalorder %s23_s21, 4  }
 0x480   :  { %22 = sbr.rel (!%p20_p4) target bundleno = 1 (0x1), region = 106 }

</bundles_post_ra>
